<compile_context>
chip_gen: v7x
topology: tpu7x:2x2x1
jax: 0.10.0
libtpu: 0.0.40
codegen_flags: <defaults>
</compile_context>

<pallas_src>
import functools

import jax
import jax.numpy as jnp
from jax.experimental import pallas as pl
from jax.experimental.pallas import tpu as pltpu

SMOOTH = 1e-6
IGNORE_INDEX = 0


def _round_up(x, m):
    return ((x + m - 1) // m) * m


def _dice_partial_kernel(pred_ref, tgt_ref, out_ref, acc_ref, *,
                         ignore_index, hw, tiles_per_split, need_mask):
    # pred_ref: (1, C, T) logits (native dtype)   tgt_ref: (1, 1, T) int32
    # out_ref : (1, 1, 3, C, 1) f32 [inter, psum, tsum], written once per
    #           (batch, spatial-split)
    # acc_ref : (3, C, 1) f32 running sums (VMEM scratch)
    k = pl.program_id(2)

    @pl.when(k == 0)
    def _init():
        acc_ref[...] = jnp.zeros_like(acc_ref)

    p = pred_ref[0].astype(jnp.float32)                  # (C, T)
    t = tgt_ref[0]                                       # (1, T) int32
    C, T = p.shape

    if need_mask:
        # Ragged tail / overhang tile: the trailing lanes of the edge block
        # contain garbage VMEM.  Sanitize logits before exp (garbage may be
        # NaN/inf) and turn garbage labels into ignore_index.
        g = pl.program_id(1) * tiles_per_split + k       # global tile index
        lane = jax.lax.broadcasted_iota(jnp.int32, (1, T), 1)
        valid = (g * T + lane) < hw                      # (1, T)
        p = jnp.where(valid, p, 0.0)
        t = jnp.where(valid, t, ignore_index)

    # Numerically stable softmax over the channel (sublane) axis.
    m = jnp.max(p, axis=0, keepdims=True)                # (1, T)
    e = jnp.exp(p - m)                                   # (C, T)
    denom = jnp.sum(e, axis=0, keepdims=True)            # (1, T)
    r = pl.reciprocal(denom, approx=True)                # EUP slot
    r = r * (2.0 - denom * r)                            # one Newton step
    sm = e * r                                           # (C, T)

    keepf = (t != ignore_index).astype(jnp.float32)      # (1, T)
    cls = jax.lax.broadcasted_iota(jnp.int32, (C, 1), 0) # (C, 1), not (C, T)
    eqf = (t == cls).astype(jnp.float32)                 # (C, T) one-hot
    smk = sm * keepf                                     # (C, T) masked pred

    # Per-tile lane reductions (XLU) into a tiny running accumulator.
    acc_ref[0] += jnp.sum(smk * eqf, axis=-1, keepdims=True)   # intersection
    acc_ref[1] += jnp.sum(smk, axis=-1, keepdims=True)         # masked pred sum
    acc_ref[2] += jnp.sum(eqf, axis=-1, keepdims=True)         # one-hot sum
    # (ignore_index row of the one-hot sum is zeroed in the JAX epilogue.)

    @pl.when(k == pl.num_programs(2) - 1)
    def _finalize():
        out_ref[0, 0] = acc_ref[...]


def dice_loss(pred, target, smooth=SMOOTH, ignore_index=IGNORE_INDEX,
              max_lane_tile=None):
    """pred: (B, C, H, W) logits; target: (B, H, W) integer labels."""
    B, C, H, W = pred.shape
    HW = H * W

    pred_bytes = pred.dtype.itemsize
    tgt_bytes = 4  # int32 labels (int8 is a further option for C < 128)

    try:
        vmem_cap = int(pltpu.get_tpu_info().vmem_capacity_bytes)
        if vmem_cap <= 0:
            vmem_cap = 64 * 1024 * 1024
    except Exception:
        vmem_cap = 64 * 1024 * 1024  # v7x worst case

    # VMEM per spatial lane: double-buffered pred + target streams, plus a
    # generous allowance for the kernel's (C,T) f32 temporaries and (1,T) rows.
    per_lane = 2 * C * pred_bytes + 2 * tgt_bytes + 8 * C * 4 + 64
    t_budget = (vmem_cap * 4 // 5) // per_lane
    t_cap = (512 * 1024) // max(C, 1)        # keep per-op vreg counts sane
    T = min(t_budget, t_cap, _round_up(HW, 128))
    if max_lane_tile is not None:
        T = min(T, max_lane_tile)
    T = max(128, (T // 128) * 128)

    num_tiles = -(-HW // T)

    # v7x megacore: batch alone can't cover both TensorCores when B == 1, so
    # split the spatial reduction into two parallel halves.
    P = 2 if (B == 1 and num_tiles >= 2) else 1
    tiles_per_split = -(-num_tiles // P)
    need_mask = (P * tiles_per_split * T) != HW

    est = per_lane * T + (2 << 20)
    vmem_limit = int(min(vmem_cap, max(est + (8 << 20), 32 << 20)))

    pred_f = pred.reshape(B, C, HW)                    # no copy, native dtype
    tgt_f = target.reshape(B, 1, HW).astype(jnp.int32)

    kernel = functools.partial(
        _dice_partial_kernel, ignore_index=ignore_index, hw=HW,
        tiles_per_split=tiles_per_split, need_mask=need_mask)

    def _blk(b, p, k):
        # Clamp overhang tiles onto the last real block; the kernel masks
        # their contribution to exactly zero.
        g = jnp.minimum(p * tiles_per_split + k, num_tiles - 1)
        return (b, 0, g)

    sums = pl.pallas_call(
        kernel,
        out_shape=jax.ShapeDtypeStruct((B, P, 3, C, 1), jnp.float32),
        grid_spec=pltpu.PrefetchScalarGridSpec(
            num_scalar_prefetch=0,
            grid=(B, P, tiles_per_split),
            in_specs=[
                pl.BlockSpec((1, C, T), _blk),
                pl.BlockSpec((1, 1, T), _blk),
            ],
            out_specs=pl.BlockSpec((1, 1, 3, C, 1),
                                   lambda b, p, k: (b, p, 0, 0, 0)),
            scratch_shapes=[pltpu.VMEM((3, C, 1), jnp.float32)],
        ),
        compiler_params=pltpu.CompilerParams(
            dimension_semantics=("parallel", "parallel", "arbitrary"),
            vmem_limit_bytes=vmem_limit),
    )(pred_f, tgt_f)

    sums = jnp.sum(sums[..., 0], axis=1)          # (B, 3, C) combine splits
    inter = sums[:, 0, :]
    psum = sums[:, 1, :]
    tsum = sums[:, 2, :]
    if 0 <= ignore_index < C:
        tsum = tsum.at[:, ignore_index].set(0.0)  # deferred ignore-row mask
    dice = (2.0 * inter + smooth) / (psum + tsum + smooth)
    return 1.0 - jnp.mean(dice)


def dice_loss_ref(pred, target, smooth=SMOOTH, ignore_index=IGNORE_INDEX):
    """Pure-JAX reference matching the PyTorch forward exactly."""
    sm = jax.nn.softmax(pred, axis=1)                                   # (B,C,H,W)
    onehot = jax.nn.one_hot(target, pred.shape[1], dtype=jnp.float32)   # (B,H,W,C)
    onehot = jnp.transpose(onehot, (0, 3, 1, 2))                        # (B,C,H,W)
    mask = (target != ignore_index)[:, None, :, :].astype(jnp.float32)
    sm = sm * mask
    onehot = onehot * mask
    inter = jnp.sum(sm * onehot, axis=(2, 3))
    union = jnp.sum(sm, axis=(2, 3)) + jnp.sum(onehot, axis=(2, 3))
    dice = (2.0 * inter + smooth) / (union + smooth)
    return 1.0 - jnp.mean(dice)


if __name__ == "__main__":
    key = jax.random.PRNGKey(0)
    k1, k2, k3, k4 = jax.random.split(key, 4)

    # Case 1: default auto-tile (single spatial tile at this size).
    B, C, H, W = 2, 4, 16, 16
    pred = jax.random.normal(k1, (B, C, H, W), dtype=jnp.float32)
    target = jax.random.randint(k2, (B, H, W), 0, C, dtype=jnp.int32)
    ref = jax.block_until_ready(dice_loss_ref(pred, target))
    loss = jax.block_until_ready(dice_loss(pred, target))
    assert jnp.allclose(loss, ref, atol=2e-5, rtol=2e-5), (loss, ref)

    # Case 2: forced small tile -> multi-tile accumulate / finalize path.
    loss_tiled = jax.block_until_ready(dice_loss(pred, target, max_lane_tile=128))
    assert jnp.allclose(loss_tiled, ref, atol=2e-5, rtol=2e-5), (loss_tiled, ref)

    # Case 3: B == 1 with ragged HW -> megacore split + overhang-tile clamp +
    # in-kernel tail masking (no wrapper-side padding).
    B2, H2, W2 = 1, 16, 17
    pred2 = jax.random.normal(k3, (B2, C, H2, W2), dtype=jnp.float32)
    target2 = jax.random.randint(k4, (B2, H2, W2), 0, C, dtype=jnp.int32)
    ref2 = jax.block_until_ready(dice_loss_ref(pred2, target2))
    loss2 = jax.block_until_ready(dice_loss(pred2, target2, max_lane_tile=128))
    assert jnp.allclose(loss2, ref2, atol=2e-5, rtol=2e-5), (loss2, ref2)

    print("KERNEL_OK")
</pallas_src>

<mosaic_0001>
module attributes {stable_mosaic.version = 11 : i64} {
  func.func @_dice_partial_kernel(%arg0: i32, %arg1: i32, %arg2: i32, %arg3: memref<1x4x256xf32, #tpu.memory_space<vmem>>, %arg4: memref<1x1x256xi32, #tpu.memory_space<vmem>>, %arg5: memref<1x1x3x4x1xf32, #tpu.memory_space<vmem>>, %arg6: memref<3x4x1xf32, #tpu.memory_space<vmem>>) attributes {dimension_semantics = [#tpu.dimension_semantics<parallel>, #tpu.dimension_semantics<parallel>, #tpu.dimension_semantics<arbitrary>], iteration_bounds = array<i64: 2, 1, 1>, scalar_prefetch = 0 : i64, scratch_operands = 1 : i64, tpu.core_type = #tpu.core_type<tc>, window_params = [{transform_indices = @transform_0, window_bounds = array<i64: 1, 4, 256>}, {transform_indices = @transform_1, window_bounds = array<i64: 1, 1, 256>}, {transform_indices = @transform_2, window_bounds = array<i64: 1, 1, 3, 4, 1>}]} {
    %c0_i32 = arith.constant 0 : i32
    %0 = arith.cmpi eq, %arg2, %c0_i32 : i32
    %1 = arith.extui %0 : i1 to i32
    %c0_i32_0 = arith.constant 0 : i32
    %2 = arith.cmpi ne, %1, %c0_i32_0 : i32
    scf.if %2 {
      %cst_30 = arith.constant 0.000000e+00 : f32
      %61 = vector.broadcast %cst_30 : f32 to vector<3x4x1xf32>
      %c0_31 = arith.constant 0 : index
      %c0_32 = arith.constant 0 : index
      %c0_33 = arith.constant 0 : index
      %62 = vector.load %arg6[%c0_31, %c0_32, %c0_33] : memref<3x4x1xf32, #tpu.memory_space<vmem>>, vector<3x4x1xf32>
      tpu.vector_store %arg6[%c0_31, %c0_32, %c0_33], %61 {strides = array<i32>} : memref<3x4x1xf32, #tpu.memory_space<vmem>>, vector<3x4x1xf32>,
    } else {
    }
    %c0 = arith.constant 0 : index
    %c0_1 = arith.constant 0 : index
    %c0_2 = arith.constant 0 : index
    %3 = vector.load %arg3[%c0, %c0_1, %c0_2] : memref<1x4x256xf32, #tpu.memory_space<vmem>>, vector<1x4x256xf32>
    %4 = vector.shape_cast %3 : vector<1x4x256xf32> to vector<4x256xf32>
    %c0_3 = arith.constant 0 : index
    %c0_4 = arith.constant 0 : index
    %c0_5 = arith.constant 0 : index
    %5 = vector.load %arg4[%c0_3, %c0_4, %c0_5] : memref<1x1x256xi32, #tpu.memory_space<vmem>>, vector<1x1x256xi32>
    %6 = vector.shape_cast %5 : vector<1x1x256xi32> to vector<1x256xi32>
    %cst = arith.constant dense<0xFF800000> : vector<256xf32>
    %7 = vector.multi_reduction <maximumf>, %4, %cst [0] : vector<4x256xf32> to vector<256xf32>
    %8 = vector.shape_cast %7 : vector<256xf32> to vector<1x256xf32>
    %9 = vector.broadcast %8 : vector<1x256xf32> to vector<4x256xf32>
    %10 = arith.subf %4, %9 : vector<4x256xf32>
    %11 = math.exp %10 : vector<4x256xf32>
    %cst_6 = arith.constant dense<0.000000e+00> : vector<256xf32>
    %12 = vector.multi_reduction <add>, %11, %cst_6 [0] : vector<4x256xf32> to vector<256xf32>
    %13 = vector.shape_cast %12 : vector<256xf32> to vector<1x256xf32>
    %14 = tpu.reciprocal %13 {approx = true} : vector<1x256xf32> -> vector<1x256xf32>
    %15 = arith.mulf %13, %14 : vector<1x256xf32>
    %cst_7 = arith.constant 2.000000e+00 : f32
    %16 = vector.broadcast %cst_7 : f32 to vector<1x256xf32>
    %17 = arith.subf %16, %15 : vector<1x256xf32>
    %18 = arith.mulf %14, %17 : vector<1x256xf32>
    %19 = vector.broadcast %18 : vector<1x256xf32> to vector<4x256xf32>
    %20 = arith.mulf %11, %19 : vector<4x256xf32>
    %c0_i32_8 = arith.constant 0 : i32
    %21 = vector.broadcast %c0_i32_8 : i32 to vector<1x256xi32>
    %22 = arith.cmpi ne, %6, %21 : vector<1x256xi32>
    %23 = arith.extui %22 : vector<1x256xi1> to vector<1x256xi32>
    %24 = arith.sitofp %23 : vector<1x256xi32> to vector<1x256xf32>
    %25 = tpu.iota {dimensions = array<i32: 0>} : vector<4x1xi32>
    %26 = vector.broadcast %6 : vector<1x256xi32> to vector<4x256xi32>
    %27 = vector.broadcast %25 : vector<4x1xi32> to vector<4x256xi32>
    %28 = arith.cmpi eq, %26, %27 : vector<4x256xi32>
    %29 = arith.extui %28 : vector<4x256xi1> to vector<4x256xi32>
    %30 = arith.sitofp %29 : vector<4x256xi32> to vector<4x256xf32>
    %31 = vector.broadcast %24 : vector<1x256xf32> to vector<4x256xf32>
    %32 = arith.mulf %20, %31 : vector<4x256xf32>
    %c0_9 = arith.constant 0 : index
    %c0_10 = arith.constant 0 : index
    %c0_11 = arith.constant 0 : index
    %33 = vector.load %arg6[%c0_9, %c0_10, %c0_11] : memref<3x4x1xf32, #tpu.memory_space<vmem>>, vector<1x4x1xf32>
    %34 = vector.shape_cast %33 : vector<1x4x1xf32> to vector<4x1xf32>
    %35 = arith.mulf %32, %30 : vector<4x256xf32>
    %cst_12 = arith.constant dense<0.000000e+00> : vector<4xf32>
    %36 = vector.multi_reduction <add>, %35, %cst_12 [1] : vector<4x256xf32> to vector<4xf32>
    %37 = vector.shape_cast %36 : vector<4xf32> to vector<4x1xf32>
    %38 = arith.addf %34, %37 : vector<4x1xf32>
    %c0_13 = arith.constant 0 : index
    %c0_14 = arith.constant 0 : index
    %c0_15 = arith.constant 0 : index
    %39 = vector.load %arg6[%c0_13, %c0_14, %c0_15] : memref<3x4x1xf32, #tpu.memory_space<vmem>>, vector<1x4x1xf32>
    %40 = vector.shape_cast %39 : vector<1x4x1xf32> to vector<4x1xf32>
    %41 = vector.shape_cast %38 : vector<4x1xf32> to vector<1x4x1xf32>
    tpu.vector_store %arg6[%c0_13, %c0_14, %c0_15], %41 {strides = array<i32>} : memref<3x4x1xf32, #tpu.memory_space<vmem>>, vector<1x4x1xf32>,
    %c1 = arith.constant 1 : index
    %c0_16 = arith.constant 0 : index
    %c0_17 = arith.constant 0 : index
    %42 = vector.load %arg6[%c1, %c0_16, %c0_17] : memref<3x4x1xf32, #tpu.memory_space<vmem>>, vector<1x4x1xf32>
    %43 = vector.shape_cast %42 : vector<1x4x1xf32> to vector<4x1xf32>
    %cst_18 = arith.constant dense<0.000000e+00> : vector<4xf32>
    %44 = vector.multi_reduction <add>, %32, %cst_18 [1] : vector<4x256xf32> to vector<4xf32>
    %45 = vector.shape_cast %44 : vector<4xf32> to vector<4x1xf32>
    %46 = arith.addf %43, %45 : vector<4x1xf32>
    %c1_19 = arith.constant 1 : index
    %c0_20 = arith.constant 0 : index
    %c0_21 = arith.constant 0 : index
    %47 = vector.load %arg6[%c1_19, %c0_20, %c0_21] : memref<3x4x1xf32, #tpu.memory_space<vmem>>, vector<1x4x1xf32>
    %48 = vector.shape_cast %47 : vector<1x4x1xf32> to vector<4x1xf32>
    %49 = vector.shape_cast %46 : vector<4x1xf32> to vector<1x4x1xf32>
    tpu.vector_store %arg6[%c1_19, %c0_20, %c0_21], %49 {strides = array<i32>} : memref<3x4x1xf32, #tpu.memory_space<vmem>>, vector<1x4x1xf32>,
    %c2 = arith.constant 2 : index
    %c0_22 = arith.constant 0 : index
    %c0_23 = arith.constant 0 : index
    %50 = vector.load %arg6[%c2, %c0_22, %c0_23] : memref<3x4x1xf32, #tpu.memory_space<vmem>>, vector<1x4x1xf32>
    %51 = vector.shape_cast %50 : vector<1x4x1xf32> to vector<4x1xf32>
    %cst_24 = arith.constant dense<0.000000e+00> : vector<4xf32>
    %52 = vector.multi_reduction <add>, %30, %cst_24 [1] : vector<4x256xf32> to vector<4xf32>
    %53 = vector.shape_cast %52 : vector<4xf32> to vector<4x1xf32>
    %54 = arith.addf %51, %53 : vector<4x1xf32>
    %c2_25 = arith.constant 2 : index
    %c0_26 = arith.constant 0 : index
    %c0_27 = arith.constant 0 : index
    %55 = vector.load %arg6[%c2_25, %c0_26, %c0_27] : memref<3x4x1xf32, #tpu.memory_space<vmem>>, vector<1x4x1xf32>
    %56 = vector.shape_cast %55 : vector<1x4x1xf32> to vector<4x1xf32>
    %57 = vector.shape_cast %54 : vector<4x1xf32> to vector<1x4x1xf32>
    tpu.vector_store %arg6[%c2_25, %c0_26, %c0_27], %57 {strides = array<i32>} : memref<3x4x1xf32, #tpu.memory_space<vmem>>, vector<1x4x1xf32>,
    %c0_i32_28 = arith.constant 0 : i32
    %58 = arith.cmpi eq, %arg2, %c0_i32_28 : i32
    %59 = arith.extui %58 : i1 to i32
    %c0_i32_29 = arith.constant 0 : i32
    %60 = arith.cmpi ne, %59, %c0_i32_29 : i32
    scf.if %60 {
      %c0_30 = arith.constant 0 : index
      %c0_31 = arith.constant 0 : index
      %c0_32 = arith.constant 0 : index
      %61 = vector.load %arg6[%c0_30, %c0_31, %c0_32] : memref<3x4x1xf32, #tpu.memory_space<vmem>>, vector<3x4x1xf32>
      %c0_33 = arith.constant 0 : index
      %c0_34 = arith.constant 0 : index
      %c0_35 = arith.constant 0 : index
      %c0_36 = arith.constant 0 : index
      %c0_37 = arith.constant 0 : index
      %62 = vector.load %arg5[%c0_33, %c0_34, %c0_35, %c0_36, %c0_37] : memref<1x1x3x4x1xf32, #tpu.memory_space<vmem>>, vector<1x1x3x4x1xf32>
      %63 = vector.shape_cast %62 : vector<1x1x3x4x1xf32> to vector<3x4x1xf32>
      %64 = vector.shape_cast %61 : vector<3x4x1xf32> to vector<1x1x3x4x1xf32>
      tpu.vector_store %arg5[%c0_33, %c0_34, %c0_35, %c0_36, %c0_37], %64 {strides = array<i32>} : memref<1x1x3x4x1xf32, #tpu.memory_space<vmem>>, vector<1x1x3x4x1xf32>,
    } else {
    }
    return
  }
  func.func @transform_0(%arg0: i32, %arg1: i32, %arg2: i32) -> (i32, i32, i32) {
    %c1_i32 = arith.constant 1 : i32
    %0 = arith.muli %arg1, %c1_i32 : i32
    %1 = arith.addi %0, %arg2 : i32
    %c0_i32 = arith.constant 0 : i32
    %2 = arith.minsi %1, %c0_i32 : i32
    %c0_i32_0 = arith.constant 0 : i32
    %c0_i32_1 = arith.constant 0 : i32
    return %arg0, %c0_i32_0, %2 : i32, i32, i32
  }
  func.func @transform_1(%arg0: i32, %arg1: i32, %arg2: i32) -> (i32, i32, i32) {
    %c1_i32 = arith.constant 1 : i32
    %0 = arith.muli %arg1, %c1_i32 : i32
    %1 = arith.addi %0, %arg2 : i32
    %c0_i32 = arith.constant 0 : i32
    %2 = arith.minsi %1, %c0_i32 : i32
    %c0_i32_0 = arith.constant 0 : i32
    %c0_i32_1 = arith.constant 0 : i32
    return %arg0, %c0_i32_0, %2 : i32, i32, i32
  }
  func.func @transform_2(%arg0: i32, %arg1: i32, %arg2: i32) -> (i32, i32, i32, i32, i32) {
    %c0_i32 = arith.constant 0 : i32
    %c0_i32_0 = arith.constant 0 : i32
    %c0_i32_1 = arith.constant 0 : i32
    %c0_i32_2 = arith.constant 0 : i32
    return %arg0, %arg1, %c0_i32, %c0_i32_0, %c0_i32_1 : i32, i32, i32, i32, i32
  }
}

</mosaic_0001>

<bundles_post_ra>
// kernel: tpu_custom_call.1
= control target key start
LH: loop header
LB: loop body
LE: loop exit
PB: predicated region body
PF: predicated region fallthrough
CT: control target
= control target key end

     0   :  { %7 = vsyncpa [#allocation4], 0  ;;  %s942_s0 = inlined_call_operand.hbm [shape: f32[2,4,256], index: 0, kind: input, shape index: {}]   ;;  %s943_s1 = inlined_call_operand.hbm [shape: s32[2,1,256], index: 1, kind: input, shape index: {}]   ;;  %s944_s2 = inlined_call_operand.vmem [shape: f32[2,1,3,4,1], index: 2, kind: output, shape index: {}]  }
   0x1   :  { %9 = vsyncpa [#allocation4 + $0x1], 0 }
   0x2   :  { %10 = vsyncpa [#allocation6], 0 }
   0x3   :  { %12 = vsyncpa [#allocation6 + $0x1], 0  ;;  %s757_s9 = smov 0   ;;  %s759_s10 = smov 0  }
   0x4   :  { %s761_s11 = smov 0   ;;  %s763_s12 = smov 0  }
   0x5   :  { %s765_s13 = smov 0   ;;  %s767_s14 = smov 0  }
   0x6 LB: > { %s533_s15 = sadd.s32 4294967295, %s737_s14   ;;  %s37_s16 = sadd.s32 1, %s733_s13  ;;  %s737_s14 = sphi %s767_s14, %s18_s14   ;;  %s733_s13 = sphi %s765_s13, %s958_s13   ;;  %s729_s12 = sphi %s763_s12, %s957_s12   ;;  %s725_s11 = sphi %s761_s11, %s956_s11   ;;  %s721_s10 = sphi %s759_s10, %s955_s10   ;;  %s717_s9 = sphi %s757_s9, %s954_s9  }
   0x7   : > { %p39_p0 = scmp.ge.s32.totalorder %s37_s16, 2  ;;  %s52_s17 = sadd.s32 1, %s725_s11 }
   0x8   : > { %p59_p1 = scmp.ne.s32.totalorder %s725_s11, %s721_s10  ;;  %p60_p2 = scmp.eq.s32.totalorder %s737_s14, 0 }
   0x9   : > { %s960_s16 = smov (%p39_p0, %s37_s16), 0  ;;  %p65_p4 = scmp.ne.s32.totalorder %s721_s10, %s717_s9 }
   0xa   : > { %p793_p3 = por %p60_p2, %p59_p1  ;;  %s47_s19 = ssub.s32 %s733_s13, %s960_s16 }
   0xb   : > { %p66_p5 = scmp.eq.s32.totalorder %s533_s15, 0  ;;  %p50_p6 = scmp.eq.s32.totalorder %s47_s19, 0 }
   0xc   : > { %p566_p8 = scmp.lt.s32.totalorder %s737_s14, 2  ;;  %s809_s22 = sand.u32 1, %s725_s11  }
   0xd   : > { %p800_p7 = por %p66_p5, %p65_p4  ;;  %s552_s23 = sshll.u32 %s733_s13, 7 }
   0xe   : > { %s806_s21 = scalar_select %p50_p6, %s725_s11, %s52_s17  }
   0xf   : > { %s947_s20 = scalar_select %p800_p7, 1, 0 }
  0x10   : > { %s537_s24 = sshll.u32 %s809_s22, 3  ;;  %s816_s27 = scalar_lea.hbm %s942_s0, %s552_s23 }
  0x11   : > { %s155_s28 = scalar_lea.vmem [#allocation3], %s537_s24  ;;  %p820_p9 = pnand %p566_p8, %p793_p3 }
  0x12   : > { %s168_s29 = sshll.u32 %s155_s28, 4  ;;  %s152_s3 = scalar_lea.sflag [#allocation4], %s809_s22  ;;  %s824_s29 = int_to_ptr.vmem [resolvable:$true] %s168_s29 }
  0x13   : > { %s623_s4 = scalar_lea.hbm %s816_s27, 128  ;;  %p625_p13 = pneg %p820_p9 }
  0x14   : > { %p624_p12 = scmp.ne.s32.totalorder %s816_s27, %s623_s4  ;;  %s628_s7 = scalar_lea.hbm %s942_s0, 256 }
  0x15   : > { %p629_p2 = scmp.lt.u32.totalorder %s816_s27, %s942_s0  ;;  %p630_p3 = scmp.lt.u32.totalorder %s628_s7, %s623_s4 }
  0x16   : > { %p626_p0 = pnand %p625_p13, %p624_p12  ;;  %p632_p5 = scmp.lt.u32.totalorder %s623_s4, %s816_s27 }
  0x17   : > { %p631_p4 = por %p630_p3, %p629_p2 }
  0x18   : > { %p627_p1 = pneg %p626_p0 }
  0x19   : > { %p633_p6 = por %p632_p5, %p631_p4 }
  0x1b   : > { %p634_p8 = pnand %p633_p6, %p627_p1 }
  0x1d   : > { %637 = shalt.err (!%p634_p8)
}
  0x1e   : > { %s638_s15 = scalar_lea.vmem %s824_s29, 128  ;;  %s739_s17 = smov [#allocation3]  }
  0x1f   : > { %p639_p12 = scmp.ne.s32.totalorder %s824_s29, %s638_s15  ;;  %s643_s18 = sshll.u32 %s739_s17, 4  ;;  %s644_s18 = int_to_ptr.vmem [resolvable:$false] %s643_s18 }
  0x20   : > { %s645_s19 = scalar_lea.vmem %s644_s18, 256  ;;  %p646_p11 = scmp.lt.s32.totalorder %s824_s29, %s644_s18 }
  0x21   : > { %p641_p0 = pnand %p639_p12, %p625_p13  ;;  %p647_p2 = scmp.lt.s32.totalorder %s645_s19, %s638_s15 }
  0x23   : > { %p642_p10 = pneg %p641_p0  ;;  %p648_p3 = por %p647_p2, %p646_p11 }
  0x25   : > { %p649_p4 = pnand %p648_p3, %p642_p10 }
  0x27   : > { %652 = shalt.err (!%p649_p4)
}
  0x28   : > { %562 = dma.hbm_to_vmem [thread:$0]  (!%p820_p9), %s816_s27, 128, %s824_s29, %s152_s3  }
  0x29   : > { %p949_p1 = scmp.lt.s32.totalorder %s737_s14, 3  ;;  %p950_p5 = scmp.ge.s32.totalorder %s737_s14, 1 }
  0x2a   : > { %s540_s24 = sshll.u32 %s809_s22, 1  ;;  %s553_s25 = sshll.u32 %s733_s13, 5 }
  0x2b   : > { %p858_p6 = pnand %p950_p5, %p949_p1  ;;  %s867_s4 = scalar_lea.hbm %s943_s1, %s553_s25 }
  0x2c   : > { %s179_s5 = scalar_lea.vmem [#allocation5], %s540_s24  ;;  %s176_s27 = scalar_lea.sflag [#allocation6], %s809_s22 }
  0x2d   : > { %s951_s23 = scalar_select %p858_p6, 1, 0 }
  0x2e   : > { %s192_s6 = sshll.u32 %s179_s5, 4  ;;  %s653_s29 = scalar_lea.hbm %s867_s4, 32  ;;  %s193_s6 = int_to_ptr.vmem [resolvable:$true] %s192_s6 }
  0x2f   : > { %p654_p10 = scmp.ne.s32.totalorder %s867_s4, %s653_s29  ;;  %s658_s8 = scalar_lea.hbm %s943_s1, 64 }
  0x30   : > { %p659_p12 = scmp.lt.u32.totalorder %s867_s4, %s943_s1  ;;  %p660_p0 = scmp.lt.u32.totalorder %s658_s8, %s653_s29 }
  0x31   : > { %p656_p11 = pnand %p654_p10, %p625_p13  ;;  %p662_p3 = scmp.lt.u32.totalorder %s653_s29, %s867_s4 }
  0x32   : > { %p661_p2 = por %p660_p0, %p659_p12 }
  0x33   : > { %p657_p8 = pneg %p656_p11 }
  0x34   : > { %p663_p4 = por %p662_p3, %p661_p2 }
  0x36   : > { %p664_p1 = pnand %p663_p4, %p657_p8 }
  0x38   : > { %667 = shalt.err (!%p664_p1)
}
  0x39   : > { %s668_s22 = scalar_lea.vmem %s193_s6, 32  ;;  %s740_s17 = smov [#allocation5]  }
  0x3a   : > { %p669_p5 = scmp.ne.s32.totalorder %s193_s6, %s668_s22  ;;  %s673_s18 = sshll.u32 %s740_s17, 4  ;;  %s674_s18 = int_to_ptr.vmem [resolvable:$false] %s673_s18 }
  0x3b   : > { %s675_s19 = scalar_lea.vmem %s674_s18, 64  ;;  %p676_p7 = scmp.lt.s32.totalorder %s193_s6, %s674_s18 }
  0x3c   : > { %p671_p10 = pnand %p669_p5, %p625_p13  ;;  %p677_p6 = scmp.lt.s32.totalorder %s675_s19, %s668_s22 }
  0x3e   : > { %p672_p11 = pneg %p671_p10  ;;  %p678_p0 = por %p677_p6, %p676_p7 }
  0x40   : > { %p679_p12 = pnand %p678_p0, %p672_p11 }
  0x42   : > { %682 = shalt.err (!%p679_p12)
}
  0x43   : > { %565 = dma.hbm_to_vmem [thread:$0]  (!%p820_p9), %s867_s4, 32, %s193_s6, %s176_s27  }
  0x44   : > { %p952_p8 = scmp.ne.s32.totalorder %s951_s23, 0 }
  0x45   : > { %s203_s24 = sand.u32 (!%p952_p8), 1, %s721_s10   ;;  %p953_p13 = scmp.ne.s32.totalorder (!%p952_p8), %s947_s20, 0 }
  0x46   : > { %201 = sbr.rel (%p952_p8) target bundleno = 317 (0x13d), region = 28  ;;  %s544_s25 = sshll.u32 (!%p952_p8), %s203_s24, 3 }
  0x47   : > { %s204_s26 = scalar_lea.sflag (!%p952_p8), [#allocation4], %s203_s24  ;;  %s207_s28 = scalar_lea.vmem (!%p952_p8), [#allocation3], %s544_s25 }
  0x4d   : > { %708 = dma.done.wait (%p953_p13), %s204_s26, 128  }
  0x4e   : > { %710 = vsyncadd (%p953_p13), %s204_s26, 4294967168  ;;  %s545_s5 = sshll.u32 %s203_s24, 1  ;;  %s213_s29 = scalar_lea.sflag [#allocation6], %s203_s24 }
  0x4f   : > { %s216_s30 = scalar_lea.vmem [#allocation5], %s545_s5 }
  0x50   : > { %712 = dma.done.wait (%p953_p13), %s213_s29, 32  }
  0x51   : > { %714 = vsyncadd (%p953_p13), %s213_s29, 4294967264  ;;  %v331_v0 = vlaneseq  ;;  %vm267_vm0 = vcmask 3072   ;;  %v741_v1 = vmov 0.0   ;;  %vm276_vm1 = vcmask 1043456   ;;  %v271_v5 = vld [vmem:[%s207_s28] sm:$0xff]  ;;  %p254_p7 = scmp.lt.s32.totalorder %s729_s12, 1 }
  0x52   : > { %268 = vst.msk [vmem:[#allocation2] sm:$0xf] %vm267_vm0, %v741_v1  ;;  %269 = vst.msk [vmem:[#allocation2 + $0x4] sm:$0xf] %vm267_vm0, %v741_v1  ;;  %v272_v6 = vld [vmem:[%s216_s30] sm:$0x3]  ;;  %v274_v7 = vcombine.high %v271_v5, %v271_v5 }
  0x53   : > { %270 = vst.msk [vmem:[#allocation2 + $0x8] sm:$0xf] %vm267_vm0, %v741_v1  ;;  %v332_v2 = vshrl.u32 %v331_v0, 7  ;;  %v277_v8 = vsel %vm276_vm1, %v271_v5, -inf  ;;  %vm328_vm2 = vcmp.ne.s32.totalorder %v272_v6, 0  ;;  %s962_s12 = smov (!%p254_p7, %s729_s12), 1 }
  0x54   : > { %v278_v10 = vrot.slane %v277_v8, 4  ;;  %v547_v11 = vsel %vm328_vm2, 1.0, %v741_v1  ;;  %v284_v13 = vsel %vm276_vm1, %v274_v7, -inf  ;;  %s554_s20 = smul.u32 12, %s962_s12 }
  0x55   : > { %v335_v3 = vsub.s32 0, %v332_v2  ;;  %v339_v4 = vsub.s32 1, %v332_v2  ;;  %v285_v17 = vrot.slane %v284_v13, 4 }
  0x56   : > { %v279_v16 = vmax.f32 %v277_v8, %v278_v10  ;;  %s262_s6 = scalar_lea.vmem %s944_s2, %s554_s20 }
  0x57   : > { %v336_v9 = vrot.slane %v272_v6, %v335_v3  ;;  %v340_v12 = vrot.slane %v272_v6, %v339_v4  ;;  %v351_v14 = vrot.slane %v547_v11, %v335_v3  ;;  %v355_v15 = vrot.slane %v547_v11, %v339_v4 }
  0x58   : > { %v280_v22 = vrot.slane %v279_v16, 2  ;;  %v286_v23 = vmax.f32 %v284_v13, %v285_v17 }
  0x59   : > { %vm341_vm3 = vcmp.eq.s32.totalorder %v336_v9, %v332_v2  ;;  %vm342_vm4 = vcmp.eq.s32.totalorder %v340_v12, %v332_v2  ;;  %v356_v20 = vcombine.low %v351_v14, %v355_v15  ;;  %v359_v13 = vld [vmem:[#allocation2] sm:$0xf] }
  0x5a   : > { %v548_v18 = vsel %vm341_vm3, 1.0, %v741_v1  ;;  %v549_v19 = vsel %vm342_vm4, 1.0, %v741_v1  ;;  %v281_v26 = vmax.f32 %v279_v16, %v280_v22  ;;  %v287_v27 = vrot.slane %v286_v23, 2  ;;  %v389_v9 = vld [vmem:[#allocation2 + $0x8] sm:$0xf] }
  0x5b   : > { %v390_v21 = vsel %vm276_vm1, %v548_v18, 0.0  ;;  %v391_v24 = vsel %vm276_vm1, %v549_v19, 0.0  ;;  %v362_v62 = vcombine.low %v548_v18, %v549_v19  ;;  %v377_v16 = vld [vmem:[#allocation2 + $0x4] sm:$0xf] }
  0x5c   : > { %v392_v25 = vadd.f32 %v391_v24, %v390_v21  ;;  %v282_v28 = vrot.slane %v281_v26, 1  ;;  %v288_v29 = vmax.f32 %v286_v23, %v287_v27 }
  0x5e   : > { %393 = vadd.xlane.f32.xlu1 %v392_v25  ;;  %v283_v30 = vmax.f32 %v281_v26, %v282_v28  ;;  %v289_v31 = vrot.slane %v288_v29, 1 }
  0x60   : > { %v290_v32 = vmax.f32 %v288_v29, %v289_v31 }
  0x62   : > { %v293_v33 = vcombine.low %v283_v30, %v290_v32 }
  0x64   : > { %v295_v34 = vsub.f32 %v271_v5, %v293_v33 }
  0x66   : > { %v296_v35 = vmul.f32 1.442695, %v295_v34 }
  0x68   : > { %617 = vpow2.f32 %v296_v35 }
  0x72   : > { %v618_v36 = vpop.eup %617 }
  0x73   : > { %v299_v37 = vcombine.high %v618_v36, %v618_v36  ;;  %v301_v38 = vsel %vm276_vm1, %v618_v36, 0.0 }
  0x74   : > { %v302_v39 = vrot.slane %v301_v38, 4 }
  0x75   : > { %v308_v40 = vsel %vm276_vm1, %v299_v37, 0.0 }
  0x76   : > { %v303_v41 = vadd.f32 %v302_v39, %v301_v38  ;;  %v309_v42 = vrot.slane %v308_v40, 4 }
  0x78   : > { %v304_v43 = vrot.slane %v303_v41, 2  ;;  %v310_v44 = vadd.f32 %v309_v42, %v308_v40 }
  0x7a   : > { %v305_v45 = vadd.f32 %v304_v43, %v303_v41  ;;  %v311_v46 = vrot.slane %v310_v44, 2 }
  0x7c   : > { %v306_v47 = vrot.slane %v305_v45, 1  ;;  %v312_v48 = vadd.f32 %v311_v46, %v310_v44 }
  0x7e   : > { %v307_v49 = vadd.f32 %v306_v47, %v305_v45  ;;  %v313_v50 = vrot.slane %v312_v48, 1 }
  0x80   : > { %v314_v51 = vadd.f32 %v313_v50, %v312_v48  ;;  %619 = vrcp.f32 %v307_v49 }
  0x82   : > { %621 = vrcp.f32 %v314_v51 }
  0x8a   : > { %v620_v52 = vpop.eup %619 }
  0x8b   : > { %v317_v53 = vmul.f32 %v620_v52, %v307_v49 }
  0x8c   : > { %v622_v54 = vpop.eup %621 }
  0x8d   : > { %v318_v55 = vmul.f32 %v622_v54, %v314_v51  ;;  %v319_v56 = vsub.f32 2.0, %v317_v53 }
  0x8f   : > { %v320_v57 = vsub.f32 2.0, %v318_v55  ;;  %v321_v58 = vmul.f32 %v620_v52, %v319_v56 }
  0x91   : > { %v322_v59 = vmul.f32 %v622_v54, %v320_v57 }
  0x93   : > { %v325_v60 = vcombine.low %v321_v58, %v322_v59 }
  0x95   : > { %v327_v61 = vmul.f32 %v618_v36, %v325_v60 }
  0x97   : > { %v358_v63 = vmul.f32 %v356_v20, %v327_v61 }
  0x99   : > { %v364_v0 = vmul.f32 %v362_v62, %v358_v63  ;;  %v379_v1 = vcombine.high %v358_v63, %v358_v63  ;;  %v381_v5 = vsel %vm276_vm1, %v358_v63, 0.0 }
  0x9b   : > { %v366_v2 = vcombine.high %v364_v0, %v364_v0  ;;  %v368_v3 = vsel %vm276_vm1, %v364_v0, 0.0  ;;  %v382_v6 = vsel %vm276_vm1, %v379_v1, 0.0 }
  0x9c   : > { %v383_v8 = vadd.f32 %v382_v6, %v381_v5 }
  0x9d   : > { %v369_v4 = vsel %vm276_vm1, %v366_v2, 0.0 }
  0x9e   : > { %v370_v7 = vadd.f32 %v369_v4, %v368_v3 }
  0xa0   : > { %371 = vadd.xlane.f32.xlu0 %v370_v7 }
  0xa4   : > { %384 = vadd.xlane.f32.xlu0 %v383_v8 }
  0xeb   : > { %v394_v10 = vpop.xlane.xlu1 %393 }
  0xec   : > { %v395_v11 = vadd.f32 %v394_v10, %v389_v9 }
  0xee   : > { %396 = vst.msk [vmem:[#allocation2 + $0x8] sm:$0xf] %vm267_vm0, %v395_v11 }
  0xf5   : > { %v402_v12 = vld [vmem:[#allocation2 + $0x8] sm:$0xf] }
  0xf6   : > { %405 = vst.msk [vmem:[%s262_s6 + $0x8] sm:$0xf] %vm267_vm0, %v402_v12 }
 0x12d   : > { %v372_v14 = vpop.xlane.xlu0 %371 }
 0x12e   : > { %v373_v15 = vadd.f32 %v372_v14, %v359_v13 }
 0x130   : > { %375 = vst.msk [vmem:[#allocation2] sm:$0xf] %vm267_vm0, %v373_v15 }
 0x131   : > { %v385_v17 = vpop.xlane.xlu0 %384 }
 0x132   : > { %v386_v18 = vadd.f32 %v385_v17, %v377_v16 }
 0x134   : > { %387 = vst.msk [vmem:[#allocation2 + $0x4] sm:$0xf] %vm267_vm0, %v386_v18 }
 0x137   : > { %v400_v19 = vld [vmem:[#allocation2] sm:$0xf] }
 0x138   : > { %403 = vst.msk [vmem:[%s262_s6] sm:$0xf] %vm267_vm0, %v400_v19 }
 0x13b   : > { %v401_v20 = vld [vmem:[#allocation2 + $0x4] sm:$0xf] }
 0x13c   : > { %404 = vst.msk [vmem:[%s262_s6 + $0x4] sm:$0xf] %vm267_vm0, %v401_v20 }
 0x13d PF: > { %s18_s14 = sadd.s32 1, %s737_s14   ;;  %s954_s9 = smov %s721_s10 }
 0x13e   : > { %p15_p9 = scmp.ge.s32.totalorder %s18_s14, 4   ;;  %s955_s10 = smov %s725_s11 }
 0x13f   : > { %s956_s11 = smov %s806_s21  ;;  %s957_s12 = smov %s733_s13 }
 0x140   : > { %s958_s13 = smov %s960_s16  ;;  %17 = sbr.rel (!%p15_p9) target bundleno = 6 (0x6), region = 91 }
 0x147   :  { %435 = vsyncpa [#allocation4], 1 }
 0x148   :  { %437 = vsyncpa [#allocation4 + $0x1], 1 }
 0x149   :  { %438 = vsyncpa [#allocation6], 1 }
 0x14a   :  { %440 = vsyncpa [#allocation6 + $0x1], 1 }

</bundles_post_ra>
